<compile_context>
chip_gen: v6e
topology: v6e:2x2x1
jax: 0.10.0
libtpu: 0.0.40
codegen_flags: <defaults>
</compile_context>

<pallas_src>
import jax
import jax.numpy as jnp
from jax import lax
from jax.experimental import pallas as pl
from jax.experimental.pallas import tpu as pltpu

LN_EPS = 1e-5


def _round_up(x, m):
    return (x + m - 1) // m * m


def _vmem_limit_bytes():
    try:
        phys = int(pltpu.get_tpu_info().vmem_capacity_bytes)
    except Exception:
        phys = 64 * 1024 * 1024            # conservative (v7x-sized) fallback
    # ~60% of physical VMEM (≈40 MiB on v7x's 64 MiB, ≈80 MiB on v5e/v6e's
    # 128 MiB), leaving headroom for Mosaic internal scratch.
    return min(int(phys * 0.6), 96 * 1024 * 1024)


def _choose_bt(B, nP, Kp, D, Np, budget):
    """Images per grid step.

    Divides B, keeps the grid >= 2 when B >= 2 (so v7x's two TensorCores both
    get work), targets >= 256 rows per step to amortize the ~0.35us per-step
    overhead (v5e is MXU-bound and wants large tiles), and fits the VMEM
    budget including the f32 LayerNorm temporaries.
    """
    def vmem_need(bt):
        return (2 * bt * nP * Kp * 2        # input tiles: 2 buffers, bf16
                + 2 * bt * D * nP * 4       # output tiles: 2 buffers, f32
                + Kp * Np * 2               # resident weight (single buffer)
                + 4 * Np * 4                # packed LN params
                + 3 * nP * Np * 4)          # y / ctr / yo f32 temporaries

    cands = [d for d in range(1, B + 1) if B % d == 0]
    if B >= 2:
        cands = [d for d in cands if d <= B // 2] or [1]
    fits = [d for d in cands if vmem_need(d) <= budget] or [min(cands)]
    big_enough = [d for d in fits if d * nP >= 256]
    return min(big_enough) if big_enough else max(fits)


def _patch_embed_kernel(x_ref, w_ref, p_ref, o_ref):
    # x_ref: (Bt, nP, Kp) bf16 patch rows (zero-padded K columns)
    # w_ref: (Kp, Np)     bf16 projection weight (zero-padded rows/cols)
    # p_ref: (4,  Np)     f32 rows: conv bias, LN gamma, LN beta, 0/1 D-mask
    # o_ref: (Bt, D, nP)  f32 output, already in the module's (D, patches) layout
    bt, d, _ = o_ref.shape
    np_pad = w_ref.shape[1]
    inv_d = 1.0 / d

    prm = p_ref[...]
    bias, gamma, beta, mask = prm[0:1], prm[1:2], prm[2:3], prm[3:4]
    w = w_ref[...]

    for t in range(bt):                      # static unroll; Bt is kept small
        y = jnp.dot(x_ref[t], w, preferred_element_type=jnp.float32) + bias
        # Padded K rows of w and padded D columns of w/bias are exactly zero,
        # so the row sums over Np equal the true sums over D.
        mean = jnp.sum(y, axis=-1, keepdims=True) * inv_d
        ctr = y - mean
        if d < np_pad:
            ctr = ctr * mask                 # zero padded cols before variance
        var = jnp.sum(ctr * ctr, axis=-1, keepdims=True) * inv_d
        yo = ctr * lax.rsqrt(var + LN_EPS) * gamma + beta       # (nP, Np) f32
        # Write directly in the consumer's layout: (nP, Np) -> (Np, nP) on the
        # XLU (slack slot), keep the first D rows.
        o_ref[t] = jnp.transpose(yo, (1, 0))[:d, :].astype(o_ref.dtype)


def prepare_patch_embed_params(proj_w, proj_b, ln_g, ln_b,
                               matmul_dtype=jnp.bfloat16):
    """Per-model preprocessing (hoisted out of the per-forward path)."""
    D, C, ph, pw = proj_w.shape
    K = C * ph * pw
    Kp = _round_up(K, 128)
    # 256-wide N tiles fill the v6e/v7x MXU; keep 128 granularity for small D
    # (and v5e) to limit padding waste.
    Np = _round_up(D, 256) if D >= 256 else _round_up(D, 128)

    w = jnp.pad(proj_w.reshape(D, K).T,
                ((0, Kp - K), (0, Np - D))).astype(matmul_dtype)

    def row(v):
        return jnp.pad(v.astype(jnp.float32), (0, Np - D))

    params = jnp.stack([row(proj_b), row(ln_g), row(ln_b),
                        row(jnp.ones((D,), jnp.float32))], axis=0)   # (4, Np)

    return {"w": w, "params": params, "matmul_dtype": matmul_dtype,
            "D": D, "C": C, "ph": ph, "pw": pw, "K": K, "Kp": Kp, "Np": Np}


def patch_embed_forward(x, prep):
    """x: (B, C, H, W) float32 (PyTorch NCHW). Returns (B, D, H//ph, W//pw)."""
    B, C, H, W = x.shape
    ph, pw, D = prep["ph"], prep["pw"], prep["D"]
    assert C == prep["C"]
    Hp, Wp = H // ph, W // pw
    nP = Hp * Wp
    K, Kp, Np = prep["K"], prep["Kp"], prep["Np"]

    # ---- patch extraction: a single fused XLA pass (transpose+pad+bf16 cast).
    # TODO(synk): fuse this pass into the kernel (grid over (B, Hp) slabs).
    xp = jnp.transpose(x.reshape(B, C, Hp, ph, Wp, pw), (0, 2, 4, 1, 3, 5))
    patches = jnp.pad(xp.reshape(B, nP, K), ((0, 0), (0, 0), (0, Kp - K)))
    patches = patches.astype(prep["matmul_dtype"])

    vmem_limit = _vmem_limit_bytes()
    Bt = _choose_bt(B, nP, Kp, D, Np, budget=int(0.85 * vmem_limit))

    cost = pl.CostEstimate(
        flops=2 * B * nP * Kp * Np + 7 * B * nP * Np,
        transcendentals=B * nP,                      # one rsqrt per patch row
        bytes_accessed=(B * nP * Kp * patches.dtype.itemsize
                        + Kp * Np * prep["w"].dtype.itemsize
                        + 4 * Np * 4
                        + B * D * nP * x.dtype.itemsize))

    def call(single_buffer_resident):
        if single_buffer_resident:
            def const_spec(shape):
                return pl.BlockSpec(shape, lambda g: (0, 0),
                                    pipeline_mode=pl.Buffered(1))
        else:
            def const_spec(shape):
                return pl.BlockSpec(shape, lambda g: (0, 0))

        return pl.pallas_call(
            _patch_embed_kernel,
            out_shape=jax.ShapeDtypeStruct((B, D, nP), x.dtype),
            grid=(B // Bt,),
            in_specs=[
                pl.BlockSpec((Bt, nP, Kp), lambda g: (g, 0, 0)),  # patch rows
                const_spec((Kp, Np)),                             # weight
                const_spec((4, Np)),                              # b/gamma/beta/mask
            ],
            out_specs=pl.BlockSpec((Bt, D, nP), lambda g: (g, 0, 0)),
            compiler_params=pltpu.CompilerParams(
                dimension_semantics=("parallel",),   # shard images over TCs
                vmem_limit_bytes=vmem_limit),
            cost_estimate=cost,
        )(patches, prep["w"], prep["params"])

    try:
        out = jax.block_until_ready(call(True))
    except Exception:
        # Buffered(1) not supported on this JAX/libtpu -> default double-buffer.
        out = call(False)

    # Free row-major reshape: (B, D, nP) -> (B, D, Hp, Wp).  No slice, no
    # transpose pass — the kernel already wrote the module's output layout.
    return out.reshape(B, D, Hp, Wp)


def _reference(x, proj_w, proj_b, ln_g, ln_b, patch_size):
    """Plain-JAX f32 reference mirroring the PyTorch forward."""
    B, C, H, W = x.shape
    ph, pw = patch_size
    D = proj_w.shape[0]
    y = lax.conv_general_dilated(
        x, proj_w, window_strides=(ph, pw), padding="VALID",
        dimension_numbers=("NCHW", "OIHW", "NCHW"),
        precision=lax.Precision.HIGHEST)
    y = y + proj_b.reshape(1, D, 1, 1)
    Bo, Co, Ho, Wo = y.shape
    t = y.reshape(Bo, Co, Ho * Wo).transpose(0, 2, 1)  # (B, nP, D)
    mean = jnp.mean(t, axis=-1, keepdims=True)
    var = jnp.mean((t - mean) ** 2, axis=-1, keepdims=True)
    t = (t - mean) / jnp.sqrt(var + LN_EPS) * ln_g + ln_b
    t = t.reshape(Bo, Ho, Wo, -1).transpose(0, 3, 1, 2)
    return t


if __name__ == "__main__":
    # Small shapes consistent with the module: img_size=16, patch_size=4,
    # in_chans=4, embed_dim=32  ->  num_patches = 16.
    B, C, H, W = 2, 4, 16, 16
    P = (4, 4)
    D = 32

    key = jax.random.PRNGKey(0)
    kx, kw, kb, kg, kbeta = jax.random.split(key, 5)
    x = jax.random.normal(kx, (B, C, H, W), dtype=jnp.float32)
    proj_w = jax.random.normal(kw, (D, C, P[0], P[1]), dtype=jnp.float32) * 0.05
    proj_b = jax.random.normal(kb, (D,), dtype=jnp.float32) * 0.05
    ln_g = 1.0 + 0.1 * jax.random.normal(kg, (D,), dtype=jnp.float32)
    ln_b = 0.1 * jax.random.normal(kbeta, (D,), dtype=jnp.float32)

    prep = prepare_patch_embed_params(proj_w, proj_b, ln_g, ln_b)
    out = patch_embed_forward(x, prep)
    out = jax.block_until_ready(out)

    ref = _reference(x, proj_w, proj_b, ln_g, ln_b, P)
    assert out.shape == (B, D, H // P[0], W // P[1]), out.shape
    # bf16 MXU inputs (f32 accumulation) vs f32 reference -> bf16-level tolerance.
    err = float(jnp.max(jnp.abs(out - ref)))
    assert jnp.allclose(out, ref, atol=2e-2, rtol=2e-2), err

    print("KERNEL_OK")
</pallas_src>

<mosaic_0001>
module attributes {stable_mosaic.version = 11 : i64} {
  func.func @_patch_embed_kernel(%arg0: i32, %arg1: memref<1x16x128xbf16, #tpu.memory_space<vmem>>, %arg2: memref<128x128xbf16, #tpu.memory_space<vmem>>, %arg3: memref<4x128xf32, #tpu.memory_space<vmem>>, %arg4: memref<1x32x16xf32, #tpu.memory_space<vmem>>) attributes {dimension_semantics = [#tpu.dimension_semantics<parallel>], iteration_bounds = array<i64: 2>, scalar_prefetch = 0 : i64, scratch_operands = 0 : i64, tpu.core_type = #tpu.core_type<tc>, window_params = [{transform_indices = @transform_0, window_bounds = array<i64: 1, 16, 128>}, {pipeline_mode = #tpu.pipeline_mode<synchronous>, transform_indices = @transform_1, window_bounds = array<i64: 128, 128>}, {pipeline_mode = #tpu.pipeline_mode<synchronous>, transform_indices = @transform_2, window_bounds = array<i64: 4, 128>}, {transform_indices = @transform_3, window_bounds = array<i64: 1, 32, 16>}]} {
    %c0 = arith.constant 0 : index
    %c0_0 = arith.constant 0 : index
    %0 = vector.load %arg3[%c0, %c0_0] : memref<4x128xf32, #tpu.memory_space<vmem>>, vector<4x128xf32>
    %1 = vector.extract_strided_slice %0 {offsets = [0, 0], sizes = [1, 128], strides = [1, 1]} : vector<4x128xf32> to vector<1x128xf32>
    %2 = vector.extract_strided_slice %0 {offsets = [1, 0], sizes = [1, 128], strides = [1, 1]} : vector<4x128xf32> to vector<1x128xf32>
    %3 = vector.extract_strided_slice %0 {offsets = [2, 0], sizes = [1, 128], strides = [1, 1]} : vector<4x128xf32> to vector<1x128xf32>
    %4 = vector.extract_strided_slice %0 {offsets = [3, 0], sizes = [1, 128], strides = [1, 1]} : vector<4x128xf32> to vector<1x128xf32>
    %c0_1 = arith.constant 0 : index
    %c0_2 = arith.constant 0 : index
    %5 = vector.load %arg2[%c0_1, %c0_2] : memref<128x128xbf16, #tpu.memory_space<vmem>>, vector<128x128xbf16>
    %c0_3 = arith.constant 0 : index
    %c0_4 = arith.constant 0 : index
    %c0_5 = arith.constant 0 : index
    %6 = vector.load %arg1[%c0_3, %c0_4, %c0_5] : memref<1x16x128xbf16, #tpu.memory_space<vmem>>, vector<1x16x128xbf16>
    %7 = vector.shape_cast %6 : vector<1x16x128xbf16> to vector<16x128xbf16>
    %cst = arith.constant dense<0.000000e+00> : vector<16x128xf32>
    %8 = tpu.matmul %7, %5, %cst {dimension_numbers = #tpu.dot_dimension_numbers<[1], [0], [0], [1], [0, 0, 1, 1], [], []>} : vector<16x128xbf16>, vector<128x128xbf16>, vector<16x128xf32> -> vector<16x128xf32>
    %9 = vector.broadcast %1 : vector<1x128xf32> to vector<16x128xf32>
    %10 = arith.addf %8, %9 : vector<16x128xf32>
    %cst_6 = arith.constant dense<0.000000e+00> : vector<16xf32>
    %11 = vector.multi_reduction <add>, %10, %cst_6 [1] : vector<16x128xf32> to vector<16xf32>
    %12 = vector.shape_cast %11 : vector<16xf32> to vector<16x1xf32>
    %cst_7 = arith.constant 3.125000e-02 : f32
    %13 = vector.broadcast %cst_7 : f32 to vector<16x1xf32>
    %14 = arith.mulf %12, %13 : vector<16x1xf32>
    %15 = vector.broadcast %14 : vector<16x1xf32> to vector<16x128xf32>
    %16 = arith.subf %10, %15 : vector<16x128xf32>
    %17 = vector.broadcast %4 : vector<1x128xf32> to vector<16x128xf32>
    %18 = arith.mulf %16, %17 : vector<16x128xf32>
    %19 = arith.mulf %18, %18 : vector<16x128xf32>
    %cst_8 = arith.constant dense<0.000000e+00> : vector<16xf32>
    %20 = vector.multi_reduction <add>, %19, %cst_8 [1] : vector<16x128xf32> to vector<16xf32>
    %21 = vector.shape_cast %20 : vector<16xf32> to vector<16x1xf32>
    %cst_9 = arith.constant 3.125000e-02 : f32
    %22 = vector.broadcast %cst_9 : f32 to vector<16x1xf32>
    %23 = arith.mulf %21, %22 : vector<16x1xf32>
    %cst_10 = arith.constant 9.99999974E-6 : f32
    %24 = vector.broadcast %cst_10 : f32 to vector<16x1xf32>
    %25 = arith.addf %23, %24 : vector<16x1xf32>
    %26 = math.rsqrt %25 : vector<16x1xf32>
    %27 = vector.broadcast %26 : vector<16x1xf32> to vector<16x128xf32>
    %28 = arith.mulf %18, %27 : vector<16x128xf32>
    %29 = vector.broadcast %2 : vector<1x128xf32> to vector<16x128xf32>
    %30 = arith.mulf %28, %29 : vector<16x128xf32>
    %31 = vector.broadcast %3 : vector<1x128xf32> to vector<16x128xf32>
    %32 = arith.addf %30, %31 : vector<16x128xf32>
    %33 = tpu.transpose %32, [1, 0] : vector<16x128xf32> -> vector<128x16xf32>
    %34 = vector.extract_strided_slice %33 {offsets = [0, 0], sizes = [32, 16], strides = [1, 1]} : vector<128x16xf32> to vector<32x16xf32>
    %c0_11 = arith.constant 0 : index
    %c0_12 = arith.constant 0 : index
    %c0_13 = arith.constant 0 : index
    %35 = vector.load %arg4[%c0_11, %c0_12, %c0_13] : memref<1x32x16xf32, #tpu.memory_space<vmem>>, vector<1x32x16xf32>
    %36 = vector.shape_cast %35 : vector<1x32x16xf32> to vector<32x16xf32>
    %37 = vector.shape_cast %34 : vector<32x16xf32> to vector<1x32x16xf32>
    tpu.vector_store %arg4[%c0_11, %c0_12, %c0_13], %37 {strides = array<i32>} : memref<1x32x16xf32, #tpu.memory_space<vmem>>, vector<1x32x16xf32>,
    return
  }
  func.func @transform_0(%arg0: i32) -> (i32, i32, i32) {
    %c0_i32 = arith.constant 0 : i32
    %c0_i32_0 = arith.constant 0 : i32
    %c0_i32_1 = arith.constant 0 : i32
    return %arg0, %c0_i32, %c0_i32_0 : i32, i32, i32
  }
  func.func @transform_1(%arg0: i32) -> (i32, i32) {
    %c0_i32 = arith.constant 0 : i32
    %c0_i32_0 = arith.constant 0 : i32
    %c0_i32_1 = arith.constant 0 : i32
    return %c0_i32, %c0_i32_0 : i32, i32
  }
  func.func @transform_2(%arg0: i32) -> (i32, i32) {
    %c0_i32 = arith.constant 0 : i32
    %c0_i32_0 = arith.constant 0 : i32
    %c0_i32_1 = arith.constant 0 : i32
    return %c0_i32, %c0_i32_0 : i32, i32
  }
  func.func @transform_3(%arg0: i32) -> (i32, i32, i32) {
    %c0_i32 = arith.constant 0 : i32
    %c0_i32_0 = arith.constant 0 : i32
    %c0_i32_1 = arith.constant 0 : i32
    return %arg0, %c0_i32, %c0_i32_0 : i32, i32, i32
  }
}

module attributes {stable_mosaic.version = 11 : i64} {
  func.func @_patch_embed_kernel(%arg0: i32, %arg1: memref<1x16x128xbf16, #tpu.memory_space<vmem>>, %arg2: memref<128x128xbf16, #tpu.memory_space<vmem>>, %arg3: memref<4x128xf32, #tpu.memory_space<vmem>>, %arg4: memref<1x32x16xf32, #tpu.memory_space<vmem>>) attributes {dimension_semantics = [#tpu.dimension_semantics<parallel>], iteration_bounds = array<i64: 2>, scalar_prefetch = 0 : i64, scratch_operands = 0 : i64, tpu.core_type = #tpu.core_type<tc>, window_params = [{transform_indices = @transform_0, window_bounds = array<i64: 1, 16, 128>}, {pipeline_mode = #tpu.pipeline_mode<synchronous>, transform_indices = @transform_1, window_bounds = array<i64: 128, 128>}, {pipeline_mode = #tpu.pipeline_mode<synchronous>, transform_indices = @transform_2, window_bounds = array<i64: 4, 128>}, {transform_indices = @transform_3, window_bounds = array<i64: 1, 32, 16>}]} {
    %c0 = arith.constant 0 : index
    %c0_0 = arith.constant 0 : index
    %0 = vector.load %arg3[%c0, %c0_0] : memref<4x128xf32, #tpu.memory_space<vmem>>, vector<4x128xf32>
    %1 = vector.extract_strided_slice %0 {offsets = [0, 0], sizes = [1, 128], strides = [1, 1]} : vector<4x128xf32> to vector<1x128xf32>
    %2 = vector.extract_strided_slice %0 {offsets = [1, 0], sizes = [1, 128], strides = [1, 1]} : vector<4x128xf32> to vector<1x128xf32>
    %3 = vector.extract_strided_slice %0 {offsets = [2, 0], sizes = [1, 128], strides = [1, 1]} : vector<4x128xf32> to vector<1x128xf32>
    %4 = vector.extract_strided_slice %0 {offsets = [3, 0], sizes = [1, 128], strides = [1, 1]} : vector<4x128xf32> to vector<1x128xf32>
    %c0_1 = arith.constant 0 : index
    %c0_2 = arith.constant 0 : index
    %5 = vector.load %arg2[%c0_1, %c0_2] : memref<128x128xbf16, #tpu.memory_space<vmem>>, vector<128x128xbf16>
    %c0_3 = arith.constant 0 : index
    %c0_4 = arith.constant 0 : index
    %c0_5 = arith.constant 0 : index
    %6 = vector.load %arg1[%c0_3, %c0_4, %c0_5] : memref<1x16x128xbf16, #tpu.memory_space<vmem>>, vector<1x16x128xbf16>
    %7 = vector.shape_cast %6 : vector<1x16x128xbf16> to vector<16x128xbf16>
    %cst = arith.constant dense<0.000000e+00> : vector<16x128xf32>
    %8 = tpu.matmul %7, %5, %cst {dimension_numbers = #tpu.dot_dimension_numbers<[1], [0], [0], [1], [0, 0, 1, 1], [], []>} : vector<16x128xbf16>, vector<128x128xbf16>, vector<16x128xf32> -> vector<16x128xf32>
    %9 = vector.broadcast %1 : vector<1x128xf32> to vector<16x128xf32>
    %10 = arith.addf %8, %9 : vector<16x128xf32>
    %cst_6 = arith.constant dense<0.000000e+00> : vector<16xf32>
    %11 = vector.multi_reduction <add>, %10, %cst_6 [1] : vector<16x128xf32> to vector<16xf32>
    %12 = vector.shape_cast %11 : vector<16xf32> to vector<16x1xf32>
    %cst_7 = arith.constant 3.125000e-02 : f32
    %13 = vector.broadcast %cst_7 : f32 to vector<16x1xf32>
    %14 = arith.mulf %12, %13 : vector<16x1xf32>
    %15 = vector.broadcast %14 : vector<16x1xf32> to vector<16x128xf32>
    %16 = arith.subf %10, %15 : vector<16x128xf32>
    %17 = vector.broadcast %4 : vector<1x128xf32> to vector<16x128xf32>
    %18 = arith.mulf %16, %17 : vector<16x128xf32>
    %19 = arith.mulf %18, %18 : vector<16x128xf32>
    %cst_8 = arith.constant dense<0.000000e+00> : vector<16xf32>
    %20 = vector.multi_reduction <add>, %19, %cst_8 [1] : vector<16x128xf32> to vector<16xf32>
    %21 = vector.shape_cast %20 : vector<16xf32> to vector<16x1xf32>
    %cst_9 = arith.constant 3.125000e-02 : f32
    %22 = vector.broadcast %cst_9 : f32 to vector<16x1xf32>
    %23 = arith.mulf %21, %22 : vector<16x1xf32>
    %cst_10 = arith.constant 9.99999974E-6 : f32
    %24 = vector.broadcast %cst_10 : f32 to vector<16x1xf32>
    %25 = arith.addf %23, %24 : vector<16x1xf32>
    %26 = math.rsqrt %25 : vector<16x1xf32>
    %27 = vector.broadcast %26 : vector<16x1xf32> to vector<16x128xf32>
    %28 = arith.mulf %18, %27 : vector<16x128xf32>
    %29 = vector.broadcast %2 : vector<1x128xf32> to vector<16x128xf32>
    %30 = arith.mulf %28, %29 : vector<16x128xf32>
    %31 = vector.broadcast %3 : vector<1x128xf32> to vector<16x128xf32>
    %32 = arith.addf %30, %31 : vector<16x128xf32>
    %33 = tpu.transpose %32, [1, 0] : vector<16x128xf32> -> vector<128x16xf32>
    %34 = vector.extract_strided_slice %33 {offsets = [0, 0], sizes = [32, 16], strides = [1, 1]} : vector<128x16xf32> to vector<32x16xf32>
    %c0_11 = arith.constant 0 : index
    %c0_12 = arith.constant 0 : index
    %c0_13 = arith.constant 0 : index
    %35 = vector.load %arg4[%c0_11, %c0_12, %c0_13] : memref<1x32x16xf32, #tpu.memory_space<vmem>>, vector<1x32x16xf32>
    %36 = vector.shape_cast %35 : vector<1x32x16xf32> to vector<32x16xf32>
    %37 = vector.shape_cast %34 : vector<32x16xf32> to vector<1x32x16xf32>
    tpu.vector_store %arg4[%c0_11, %c0_12, %c0_13], %37 {strides = array<i32>} : memref<1x32x16xf32, #tpu.memory_space<vmem>>, vector<1x32x16xf32>,
    return
  }
  func.func @transform_0(%arg0: i32) -> (i32, i32, i32) {
    %c0_i32 = arith.constant 0 : i32
    %c0_i32_0 = arith.constant 0 : i32
    %c0_i32_1 = arith.constant 0 : i32
    return %arg0, %c0_i32, %c0_i32_0 : i32, i32, i32
  }
  func.func @transform_1(%arg0: i32) -> (i32, i32) {
    %c0_i32 = arith.constant 0 : i32
    %c0_i32_0 = arith.constant 0 : i32
    %c0_i32_1 = arith.constant 0 : i32
    return %c0_i32, %c0_i32_0 : i32, i32
  }
  func.func @transform_2(%arg0: i32) -> (i32, i32) {
    %c0_i32 = arith.constant 0 : i32
    %c0_i32_0 = arith.constant 0 : i32
    %c0_i32_1 = arith.constant 0 : i32
    return %c0_i32, %c0_i32_0 : i32, i32
  }
  func.func @transform_3(%arg0: i32) -> (i32, i32, i32) {
    %c0_i32 = arith.constant 0 : i32
    %c0_i32_0 = arith.constant 0 : i32
    %c0_i32_1 = arith.constant 0 : i32
    return %arg0, %c0_i32, %c0_i32_0 : i32, i32, i32
  }
}

</mosaic_0001>

<bundles_post_ra>
// kernel: tpu_custom_call.1
= control target key start
LH: loop header
LB: loop body
LE: loop exit
PB: predicated region body
PF: predicated region fallthrough
CT: control target
= control target key end

     0   :  { %8 = vsyncpa [#allocation3], 0  ;;  %s928_s0 = inlined_call_operand.hbm [shape: bf16[2,16,128], index: 0, kind: input, shape index: {}]   ;;  %s929_s1 = inlined_call_operand.hbm [shape: bf16[128,128], index: 1, kind: input, shape index: {}]   ;;  %s930_s2 = inlined_call_operand.hbm [shape: f32[4,128], index: 2, kind: input, shape index: {}]   ;;  %s931_s3 = inlined_call_operand.vmem [shape: f32[2,32,16], index: 3, kind: output, shape index: {}]  }
   0x1   :  { %10 = vsyncpa [#allocation3 + $0x1], 0 }
   0x2   :  { %11 = vsyncpa [#allocation5], 0  ;;  %s780_s12 = smov 0   ;;  %s782_s13 = smov 0  }
   0x3   :  { %s784_s14 = smov 0   ;;  %s786_s15 = smov 0  }
   0x4 LB: > { %s799_s16 = sadd.s32 4294967295, %s751_s15   ;;  %p37_p0 = scmp.ne.s32.totalorder %s743_s13, %s739_s12  ;;  %s751_s15 = sphi %s786_s15, %s946_s15   ;;  %s747_s14 = sphi %s784_s14, %s945_s14   ;;  %s743_s13 = sphi %s782_s13, %s944_s13   ;;  %s739_s12 = sphi %s780_s12, %s943_s12  }
   0x5   : > { %p932_p1 = scmp.eq.s32.totalorder %s799_s16, 0  ;;  %p501_p2 = scmp.ge.s32.totalorder %s751_s15, 1 }
   0x6   : > { %p116_p3 = scmp.lt.s32.totalorder %s751_s15, 3  ;;  %s753_s19 = smov [#allocation4]  }
   0x7   : > { %p807_p4 = por %p932_p1, %p37_p0  ;;  %s128_s20 = sshll.u32 %s753_s19, 4  ;;  %s129_s20 = int_to_ptr.vmem [resolvable:$true] %s128_s20 }
   0x8   : > { %p811_p5 = pnand %p501_p2, %p116_p3  ;;  %s754_s22 = smov [#allocation6]  }
   0x9   : > { %s935_s17 = scalar_select %p807_p4, 1, 0 }
   0xa   : > { %s936_s18 = scalar_select %p811_p5, 1, 0 }
   0xb   : > { %p566_p6 = pneg %p811_p5  ;;  %s142_s23 = sshll.u32 %s754_s22, 4  ;;  %s143_s23 = int_to_ptr.vmem [resolvable:$true] %s142_s23 }
   0xc   : > { %s644_s24 = scalar_lea.vmem %s129_s20, 1024  ;;  %p652_p12 = scmp.lt.s32.totalorder %s129_s20, %s129_s20 }
   0xd   : > { %p819_p7 = pnand %p566_p6, %p932_p1  ;;  %p645_p9 = scmp.ne.s32.totalorder %s129_s20, %s644_s24 }
   0xe   : > { %p653_p13 = scmp.lt.s32.totalorder %s644_s24, %s644_s24 }
   0xf   : > { %p635_p8 = pneg %p819_p7 }
  0x10   : > { %p654_p0 = por %p653_p13, %p652_p12 }
  0x11   : > { %p647_p10 = pnand %p645_p9, %p635_p8 }
  0x13   : > { %p648_p11 = pneg %p647_p10 }
  0x15   : > { %p655_p2 = pnand %p654_p0, %p648_p11 }
  0x17   : > { %658 = shalt.err (!%p655_p2)
}
  0x18   : > { %s755_s25 = smov 64   ;;  %s756_s26 = smov 4  }
  0x19   : > { %569 = dma.hbm_to_vmem [thread:$0]  (!%p819_p7), %s929_s1, 1024, %s129_s20, [#allocation5], %s755_s25, %s755_s25, %s756_s26  }
  0x1a   : > { %s670_s29 = scalar_lea.vmem %s143_s23, 64  ;;  %p678_p10 = scmp.lt.s32.totalorder %s143_s23, %s143_s23 }
  0x1b   : > { %p671_p3 = scmp.ne.s32.totalorder %s143_s23, %s670_s29  ;;  %p679_p11 = scmp.lt.s32.totalorder %s670_s29, %s670_s29 }
  0x1d   : > { %p673_p6 = pnand %p671_p3, %p635_p8  ;;  %p680_p12 = por %p679_p11, %p678_p10 }
  0x1f   : > { %p674_p9 = pneg %p673_p6 }
  0x21   : > { %p681_p13 = pnand %p680_p12, %p674_p9 }
  0x23   : > { %684 = shalt.err (!%p681_p13)
}
  0x24   : > { %572 = dma.hbm_to_vmem [thread:$0]  (!%p819_p7), %s930_s2, 64, %s143_s23, [#allocation5]  }
  0x25   : > { %s845_s5 = sadd.s32 1, %s751_s15   ;;  %s24_s6 = sadd.s32 1, %s747_s14 }
  0x26   : > { %s21_s7 = ssub.s32 %s751_s15, %s845_s5  ;;  %p31_p8 = scmp.ne.s32.totalorder %s747_s14, %s743_s13 }
  0x27   : > { %p22_p0 = scmp.eq.s32.totalorder %s21_s7, 0  ;;  %p32_p2 = scmp.eq.s32.totalorder %s751_s15, 0 }
  0x28   : > { %p579_p3 = scmp.lt.s32.totalorder %s751_s15, 2  ;;  %s153_s8 = sand.u32 1, %s747_s14  }
  0x29   : > { %s856_s9 = scalar_select %p22_p0, %s747_s14, %s24_s6  }
  0x2a   : > { %p33_p6 = por %p32_p2, %p31_p8  ;;  %s505_s10 = sshll.u32 %s153_s8, 3 }
  0x2b   : > { %s525_s11 = sshll.u32 %s751_s15, 7  ;;  %s157_s21 = scalar_lea.vmem [#allocation2], %s505_s10 }
  0x2c   : > { %s862_s20 = scalar_lea.hbm %s928_s0, %s525_s11  ;;  %s164_s22 = sshll.u32 %s157_s21, 4  ;;  %s868_s22 = int_to_ptr.vmem [resolvable:$true] %s164_s22 }
  0x2d   : > { %p864_p7 = pnand %p579_p3, %p33_p6  ;;  %s870_s24 = scalar_lea.sflag [#allocation3], %s153_s8 }
  0x2e   : > { %s685_s15 = scalar_lea.hbm %s862_s20, 128  ;;  %s690_s29 = scalar_lea.hbm %s928_s0, 256 }
  0x2f   : > { %p686_p9 = scmp.ne.s32.totalorder %s862_s20, %s685_s15  ;;  %p687_p10 = pneg %p864_p7 }
  0x30   : > { %p691_p13 = scmp.lt.s32.totalorder %s862_s20, %s928_s0  ;;  %p692_p8 = scmp.lt.s32.totalorder %s690_s29, %s685_s15 }
  0x31   : > { %p688_p11 = pnand %p687_p10, %p686_p9 }
  0x32   : > { %p693_p0 = por %p692_p8, %p691_p13 }
  0x33   : > { %p689_p12 = pneg %p688_p11 }
  0x35   : > { %p694_p2 = pnand %p693_p0, %p689_p12 }
  0x37   : > { %697 = shalt.err (!%p694_p2)
}
  0x38   : > { %s698_s6 = scalar_lea.vmem %s868_s22, 128  ;;  %s757_s7 = smov [#allocation2]  }
  0x39   : > { %p699_p3 = scmp.ne.s32.totalorder %s868_s22, %s698_s6  ;;  %s703_s8 = sshll.u32 %s757_s7, 4  ;;  %s704_s8 = int_to_ptr.vmem [resolvable:$false] %s703_s8 }
  0x3a   : > { %s705_s10 = scalar_lea.vmem %s704_s8, 256  ;;  %p706_p11 = scmp.lt.s32.totalorder %s868_s22, %s704_s8 }
  0x3b   : > { %p701_p6 = pnand %p699_p3, %p687_p10  ;;  %p707_p1 = scmp.lt.s32.totalorder %s705_s10, %s698_s6 }
  0x3d   : > { %p702_p9 = pneg %p701_p6  ;;  %p708_p4 = por %p707_p1, %p706_p11 }
  0x3f   : > { %p709_p5 = pnand %p708_p4, %p702_p9 }
  0x41   : > { %712 = shalt.err (!%p709_p5)
}
  0x42   : > { %576 = dma.hbm_to_vmem [thread:$0]  (!%p864_p7), %s862_s20, 128, %s868_s22, %s870_s24, %s755_s25, %s755_s25, %s756_s26  }
  0x43   : > { %p939_p10 = scmp.ne.s32.totalorder %s936_s18, 0 }
  0x44   : > { %s178_s11 = sand.u32 (!%p939_p10), 1, %s743_s13   ;;  %p940_p1 = scmp.ne.s32.totalorder (!%p939_p10), %s935_s17, 0 }
  0x45   : > { %176 = sbr.rel (%p939_p10) target bundleno = 752 (0x2f0), region = 32  ;;  %s897_s12 = sshll.u32 (!%p939_p10), %s178_s11, 3 }
  0x46   : > { %s179_s19 = scalar_lea.sflag (!%p939_p10), [#allocation3], %s178_s11  ;;  %s182_s21 = scalar_lea.vmem (!%p939_p10), [#allocation2], %s897_s12 }
  0x4a   : > { %730 = dma.done.wait (%p940_p1), %s179_s19, 128  }
  0x4b   : > { %732 = vsyncadd (%p940_p1), %s179_s19, 4294967168  ;;  %p941_p4 = scmp.eq.s32.totalorder %s799_s16, 0 }
  0x4d   : > { %734 = dma.done.wait (%p941_p4), [#allocation5], 1088   ;;  %p942_p5 = pmov %p941_p4 }
  0x4e   : > { %v758_v0 = vmov 0.0   ;;  %vm759_vm0 = vmmov 0   ;;  %v620_v1 = vld [vmem:[#allocation4 + $0x38] sm:$0xff]   ;;  %v621_v2 = vld [vmem:[#allocation4 + $0x30] sm:$0xff]   ;;  %v622_v3 = vld [vmem:[#allocation4 + $0x28] sm:$0xff]   ;;  %v238_v10 = vlaneseq  ;;  %p213_p7 = scmp.lt.s32.totalorder %s799_s16, 1 }
  0x4f   : > { %736 = vsyncadd (%p942_p5), [#allocation5], 4294966208  ;;  %536 = vmatprep.subr.bf16.mxu0 %v758_v0  ;;  %552 = vmatprep.mubr.msk.bf16.mxu0 %vm759_vm0, %v758_v0  ;;  %v623_v4 = vld [vmem:[#allocation4 + $0x20] sm:$0xff]   ;;  %v624_v5 = vld [vmem:[#allocation4 + $0x18] sm:$0xff]   ;;  %vm409_vm1 = vcmask 130048  }
  0x50   : > { %537 = vmatpush3.bf16.msra.mxu0 %v620_v1  ;;  %v625_v6 = vld [vmem:[#allocation4 + $0x10] sm:$0xff]   ;;  %v626_v7 = vld [vmem:[#allocation4 + $0x8] sm:$0xff]   ;;  %v627_v8 = vld [vmem:[#allocation4] sm:$0xff]   ;;  %v239_v11 = vshrl.u32 %v238_v10, 7  ;;  %s948_s16 = smov (!%p213_p7, %s799_s16), 1 }
  0x51   : > { %538 = vmatprep.subr.bf16.mxu0 %v758_v0  ;;  %v628_v9 = vld [vmem:[%s182_s21] sm:$0xff]   ;;  %v219_v13 = vld [vmem:[#allocation6] sm:$0xf]  ;;  %s526_s17 = sshll.u32 %s948_s16, 5 }
  0x52   : > { %v240_v12 = vsub.s32 0, %v239_v11  ;;  %v347_v21 = vsub.s32 3, %v239_v11  ;;  %v367_v39 = vsub.s32 1, %v239_v11  ;;  %v373_v40 = vsub.s32 2, %v239_v11  ;;  %s217_s26 = scalar_lea.vmem %s931_s3, %s526_s17 }
  0x54   : > { %539 = vmatpush3.bf16.msra.mxu0 %v621_v2  ;;  %v241_v14 = vrot.slane %v219_v13, %v240_v12  ;;  %v348_v24 = vrot.slane %v219_v13, %v347_v21  ;;  %v368_v41 = vrot.slane %v219_v13, %v367_v39  ;;  %v374_v44 = vrot.slane %v219_v13, %v373_v40 }
  0x55   : > { %540 = vmatprep.subr.bf16.mxu0 %v758_v0 }
  0x58   : > { %541 = vmatpush3.bf16.msra.mxu0 %v622_v3 }
  0x59   : > { %542 = vmatprep.subr.bf16.mxu0 %v758_v0 }
  0x5c   : > { %543 = vmatpush3.bf16.msra.mxu0 %v623_v4 }
  0x5d   : > { %544 = vmatprep.subr.bf16.mxu0 %v758_v0 }
  0x60   : > { %545 = vmatpush3.bf16.msra.mxu0 %v624_v5 }
  0x61   : > { %546 = vmatprep.subr.bf16.mxu0 %v758_v0 }
  0x64   : > { %547 = vmatpush3.bf16.msra.mxu0 %v625_v6 }
  0x65   : > { %548 = vmatprep.subr.bf16.mxu0 %v758_v0 }
  0x68   : > { %549 = vmatpush3.bf16.msra.mxu0 %v626_v7 }
  0x69   : > { %550 = vmatprep.subr.bf16.mxu0 %v758_v0 }
  0x6c   : > { %551 = vmatpush3.bf16.msra.mxu0 %v627_v8 }
  0x6f   : > { %553 = vmatmul.mubr.bf16.vlgmr.msra.gmra.mxu0 %v628_v9 }
 0x12f   : > { %v330_v15 = vpop.f32.mrf.mxu0 }
 0x130   : > { %v331_v16 = vadd.f32 %v330_v15, %v241_v14 }
 0x131   : > { %v554_v17 = vpop.f32.mrf.mxu0 }
 0x132   : > { %337 = vadd.xlane.f32.xlu0 %v331_v16 }
 0x133   : > { %v333_v18 = vpop.f32.mrf.mxu0 }
 0x134   : > { %v334_v19 = vadd.f32 %v333_v18, %v241_v14 }
 0x135   : > { %v555_v20 = vpop.f32.mrf.mxu0 }
 0x136   : > { %339 = vadd.xlane.f32.xlu0 %v334_v19 }
 0x1bb   : > { %v338_v22 = vpop.xlane.xlu0 %337 }
 0x1bc   : > { %v341_v23 = vmul.f32 0.03125, %v338_v22 }
 0x1be   : > { %v343_v25 = vsub.f32 %v331_v16, %v341_v23 }
 0x1bf   : > { %v340_v26 = vpop.xlane.xlu0 %339 }
 0x1c0   : > { %v342_v27 = vmul.f32 0.03125, %v340_v26  ;;  %v349_v28 = vmul.f32 %v348_v24, %v343_v25 }
 0x1c2   : > { %v344_v29 = vsub.f32 %v334_v19, %v342_v27  ;;  %v351_v30 = vmul.f32 %v349_v28, %v349_v28 }
 0x1c4   : > { %353 = vadd.xlane.f32.xlu1 %v351_v30  ;;  %v350_v31 = vmul.f32 %v348_v24, %v344_v29 }
 0x1c6   : > { %v352_v32 = vmul.f32 %v350_v31, %v350_v31 }
 0x1c8   : > { %355 = vadd.xlane.f32.xlu1 %v352_v32 }
 0x24d   : > { %v354_v33 = vpop.xlane.xlu1 %353 }
 0x24e   : > { %v357_v34 = vmul.f32 0.03125, %v354_v33 }
 0x250   : > { %v359_v35 = vadd.f32 1e-05, %v357_v34 }
 0x251   : > { %v356_v36 = vpop.xlane.xlu1 %355 }
 0x252   : > { %629 = vrsqrt.f32 %v359_v35  ;;  %v358_v37 = vmul.f32 0.03125, %v356_v36 }
 0x254   : > { %v360_v38 = vadd.f32 1e-05, %v358_v37 }
 0x256   : > { %631 = vrsqrt.f32 %v360_v38 }
 0x25f   : > { %v630_v42 = vpop.eup %629 }
 0x260   : > { %v363_v43 = vmul.f32 %v630_v42, %v349_v28 }
 0x262   : > { %v369_v45 = vmul.f32 %v368_v41, %v363_v43 }
 0x263   : > { %v632_v46 = vpop.eup %631 }
 0x264   : > { %v375_v47 = vadd.f32 %v374_v44, %v369_v45  ;;  %v364_v48 = vmul.f32 %v632_v46, %v350_v31 }
 0x266   : > { %377 = vxpose.xlu0.b32.start [1/2] (short) (narrow) %v375_v47, 32  ;;  %v370_v49 = vmul.f32 %v368_v41, %v364_v48 }
 0x268   : > { %v376_v50 = vadd.f32 %v374_v44, %v370_v49 }
 0x26a   : > { %378 = vxpose.xlu0.b32.end [2/2] (short) (narrow) %v376_v50, 32 }
 0x2e2   : > { %v393_v51 = vpop.trf.xlu0 }
 0x2e3   : > { %410 = vst.msk [vmem:[%s217_s26] sm:$0xff] %vm409_vm1, %v393_v51 }
 0x2e6   : > { %v394_v52 = vpop.trf.xlu0 }
 0x2e7   : > { %411 = vst.msk [vmem:[%s217_s26 + $0x8] sm:$0xff] %vm409_vm1, %v394_v52 }
 0x2ea   : > { %v395_v53 = vpop.trf.xlu0 }
 0x2eb   : > { %412 = vst.msk [vmem:[%s217_s26 + $0x10] sm:$0xff] %vm409_vm1, %v395_v53 }
 0x2ee   : > { %v396_v54 = vpop.trf.xlu0 }
 0x2ef   : > { %413 = vst.msk [vmem:[%s217_s26 + $0x18] sm:$0xff] %vm409_vm1, %v396_v54 }
 0x2f0 PF: > { %p14_p12 = scmp.ge.s32.totalorder %s845_s5, 4   ;;  %s943_s12 = smov %s743_s13 }
 0x2f1   : > { %s944_s13 = smov %s747_s14  ;;  %s945_s14 = smov %s856_s9 }
 0x2f2   : > { %s946_s15 = smov %s845_s5  ;;  %16 = sbr.rel (!%p14_p12) target bundleno = 4 (0x4), region = 80 }
 0x2f7   :  { %435 = vsyncpa [#allocation3], 1 }
 0x2f8   :  { %437 = vsyncpa [#allocation3 + $0x1], 1 }
 0x2f9   :  { %438 = vsyncpa [#allocation5], 1 }

// kernel: tpu_custom_call.1
= control target key start
LH: loop header
LB: loop body
LE: loop exit
PB: predicated region body
PF: predicated region fallthrough
CT: control target
= control target key end

     0   :  { %8 = vsyncpa [#allocation3], 0  ;;  %s928_s0 = inlined_call_operand.hbm [shape: bf16[2,16,128], index: 0, kind: input, shape index: {}]   ;;  %s929_s1 = inlined_call_operand.hbm [shape: bf16[128,128], index: 1, kind: input, shape index: {}]   ;;  %s930_s2 = inlined_call_operand.hbm [shape: f32[4,128], index: 2, kind: input, shape index: {}]   ;;  %s931_s3 = inlined_call_operand.vmem [shape: f32[2,32,16], index: 3, kind: output, shape index: {}]  }
   0x1   :  { %10 = vsyncpa [#allocation3 + $0x1], 0 }
   0x2   :  { %11 = vsyncpa [#allocation5], 0  ;;  %s780_s12 = smov 0   ;;  %s782_s13 = smov 0  }
   0x3   :  { %s784_s14 = smov 0   ;;  %s786_s15 = smov 0  }
   0x4 LB: > { %s799_s16 = sadd.s32 4294967295, %s751_s15   ;;  %p37_p0 = scmp.ne.s32.totalorder %s743_s13, %s739_s12  ;;  %s751_s15 = sphi %s786_s15, %s946_s15   ;;  %s747_s14 = sphi %s784_s14, %s945_s14   ;;  %s743_s13 = sphi %s782_s13, %s944_s13   ;;  %s739_s12 = sphi %s780_s12, %s943_s12  }
   0x5   : > { %p932_p1 = scmp.eq.s32.totalorder %s799_s16, 0  ;;  %p501_p2 = scmp.ge.s32.totalorder %s751_s15, 1 }
   0x6   : > { %p116_p3 = scmp.lt.s32.totalorder %s751_s15, 3  ;;  %s753_s19 = smov [#allocation4]  }
   0x7   : > { %p807_p4 = por %p932_p1, %p37_p0  ;;  %s128_s20 = sshll.u32 %s753_s19, 4  ;;  %s129_s20 = int_to_ptr.vmem [resolvable:$true] %s128_s20 }
   0x8   : > { %p811_p5 = pnand %p501_p2, %p116_p3  ;;  %s754_s22 = smov [#allocation6]  }
   0x9   : > { %s935_s17 = scalar_select %p807_p4, 1, 0 }
   0xa   : > { %s936_s18 = scalar_select %p811_p5, 1, 0 }
   0xb   : > { %p566_p6 = pneg %p811_p5  ;;  %s142_s23 = sshll.u32 %s754_s22, 4  ;;  %s143_s23 = int_to_ptr.vmem [resolvable:$true] %s142_s23 }
   0xc   : > { %s644_s24 = scalar_lea.vmem %s129_s20, 1024  ;;  %p652_p12 = scmp.lt.s32.totalorder %s129_s20, %s129_s20 }
   0xd   : > { %p819_p7 = pnand %p566_p6, %p932_p1  ;;  %p645_p9 = scmp.ne.s32.totalorder %s129_s20, %s644_s24 }
   0xe   : > { %p653_p13 = scmp.lt.s32.totalorder %s644_s24, %s644_s24 }
   0xf   : > { %p635_p8 = pneg %p819_p7 }
  0x10   : > { %p654_p0 = por %p653_p13, %p652_p12 }
  0x11   : > { %p647_p10 = pnand %p645_p9, %p635_p8 }
  0x13   : > { %p648_p11 = pneg %p647_p10 }
  0x15   : > { %p655_p2 = pnand %p654_p0, %p648_p11 }
  0x17   : > { %658 = shalt.err (!%p655_p2)
}
  0x18   : > { %s755_s25 = smov 64   ;;  %s756_s26 = smov 4  }
  0x19   : > { %569 = dma.hbm_to_vmem [thread:$0]  (!%p819_p7), %s929_s1, 1024, %s129_s20, [#allocation5], %s755_s25, %s755_s25, %s756_s26  }
  0x1a   : > { %s670_s29 = scalar_lea.vmem %s143_s23, 64  ;;  %p678_p10 = scmp.lt.s32.totalorder %s143_s23, %s143_s23 }
  0x1b   : > { %p671_p3 = scmp.ne.s32.totalorder %s143_s23, %s670_s29  ;;  %p679_p11 = scmp.lt.s32.totalorder %s670_s29, %s670_s29 }
  0x1d   : > { %p673_p6 = pnand %p671_p3, %p635_p8  ;;  %p680_p12 = por %p679_p11, %p678_p10 }
  0x1f   : > { %p674_p9 = pneg %p673_p6 }
  0x21   : > { %p681_p13 = pnand %p680_p12, %p674_p9 }
  0x23   : > { %684 = shalt.err (!%p681_p13)
}
  0x24   : > { %572 = dma.hbm_to_vmem [thread:$0]  (!%p819_p7), %s930_s2, 64, %s143_s23, [#allocation5]  }
  0x25   : > { %s845_s5 = sadd.s32 1, %s751_s15   ;;  %s24_s6 = sadd.s32 1, %s747_s14 }
  0x26   : > { %s21_s7 = ssub.s32 %s751_s15, %s845_s5  ;;  %p31_p8 = scmp.ne.s32.totalorder %s747_s14, %s743_s13 }
  0x27   : > { %p22_p0 = scmp.eq.s32.totalorder %s21_s7, 0  ;;  %p32_p2 = scmp.eq.s32.totalorder %s751_s15, 0 }
  0x28   : > { %p579_p3 = scmp.lt.s32.totalorder %s751_s15, 2  ;;  %s153_s8 = sand.u32 1, %s747_s14  }
  0x29   : > { %s856_s9 = scalar_select %p22_p0, %s747_s14, %s24_s6  }
  0x2a   : > { %p33_p6 = por %p32_p2, %p31_p8  ;;  %s505_s10 = sshll.u32 %s153_s8, 3 }
  0x2b   : > { %s525_s11 = sshll.u32 %s751_s15, 7  ;;  %s157_s21 = scalar_lea.vmem [#allocation2], %s505_s10 }
  0x2c   : > { %s862_s20 = scalar_lea.hbm %s928_s0, %s525_s11  ;;  %s164_s22 = sshll.u32 %s157_s21, 4  ;;  %s868_s22 = int_to_ptr.vmem [resolvable:$true] %s164_s22 }
  0x2d   : > { %p864_p7 = pnand %p579_p3, %p33_p6  ;;  %s870_s24 = scalar_lea.sflag [#allocation3], %s153_s8 }
  0x2e   : > { %s685_s15 = scalar_lea.hbm %s862_s20, 128  ;;  %s690_s29 = scalar_lea.hbm %s928_s0, 256 }
  0x2f   : > { %p686_p9 = scmp.ne.s32.totalorder %s862_s20, %s685_s15  ;;  %p687_p10 = pneg %p864_p7 }
  0x30   : > { %p691_p13 = scmp.lt.s32.totalorder %s862_s20, %s928_s0  ;;  %p692_p8 = scmp.lt.s32.totalorder %s690_s29, %s685_s15 }
  0x31   : > { %p688_p11 = pnand %p687_p10, %p686_p9 }
  0x32   : > { %p693_p0 = por %p692_p8, %p691_p13 }
  0x33   : > { %p689_p12 = pneg %p688_p11 }
  0x35   : > { %p694_p2 = pnand %p693_p0, %p689_p12 }
  0x37   : > { %697 = shalt.err (!%p694_p2)
}
  0x38   : > { %s698_s6 = scalar_lea.vmem %s868_s22, 128  ;;  %s757_s7 = smov [#allocation2]  }
  0x39   : > { %p699_p3 = scmp.ne.s32.totalorder %s868_s22, %s698_s6  ;;  %s703_s8 = sshll.u32 %s757_s7, 4  ;;  %s704_s8 = int_to_ptr.vmem [resolvable:$false] %s703_s8 }
  0x3a   : > { %s705_s10 = scalar_lea.vmem %s704_s8, 256  ;;  %p706_p11 = scmp.lt.s32.totalorder %s868_s22, %s704_s8 }
  0x3b   : > { %p701_p6 = pnand %p699_p3, %p687_p10  ;;  %p707_p1 = scmp.lt.s32.totalorder %s705_s10, %s698_s6 }
  0x3d   : > { %p702_p9 = pneg %p701_p6  ;;  %p708_p4 = por %p707_p1, %p706_p11 }
  0x3f   : > { %p709_p5 = pnand %p708_p4, %p702_p9 }
  0x41   : > { %712 = shalt.err (!%p709_p5)
}
  0x42   : > { %576 = dma.hbm_to_vmem [thread:$0]  (!%p864_p7), %s862_s20, 128, %s868_s22, %s870_s24, %s755_s25, %s755_s25, %s756_s26  }
  0x43   : > { %p939_p10 = scmp.ne.s32.totalorder %s936_s18, 0 }
  0x44   : > { %s178_s11 = sand.u32 (!%p939_p10), 1, %s743_s13   ;;  %p940_p1 = scmp.ne.s32.totalorder (!%p939_p10), %s935_s17, 0 }
  0x45   : > { %176 = sbr.rel (%p939_p10) target bundleno = 752 (0x2f0), region = 32  ;;  %s897_s12 = sshll.u32 (!%p939_p10), %s178_s11, 3 }
  0x46   : > { %s179_s19 = scalar_lea.sflag (!%p939_p10), [#allocation3], %s178_s11  ;;  %s182_s21 = scalar_lea.vmem (!%p939_p10), [#allocation2], %s897_s12 }
  0x4a   : > { %730 = dma.done.wait (%p940_p1), %s179_s19, 128  }
  0x4b   : > { %732 = vsyncadd (%p940_p1), %s179_s19, 4294967168  ;;  %p941_p4 = scmp.eq.s32.totalorder %s799_s16, 0 }
  0x4d   : > { %734 = dma.done.wait (%p941_p4), [#allocation5], 1088   ;;  %p942_p5 = pmov %p941_p4 }
  0x4e   : > { %v758_v0 = vmov 0.0   ;;  %vm759_vm0 = vmmov 0   ;;  %v620_v1 = vld [vmem:[#allocation4 + $0x38] sm:$0xff]   ;;  %v621_v2 = vld [vmem:[#allocation4 + $0x30] sm:$0xff]   ;;  %v622_v3 = vld [vmem:[#allocation4 + $0x28] sm:$0xff]   ;;  %v238_v10 = vlaneseq  ;;  %p213_p7 = scmp.lt.s32.totalorder %s799_s16, 1 }
  0x4f   : > { %736 = vsyncadd (%p942_p5), [#allocation5], 4294966208  ;;  %536 = vmatprep.subr.bf16.mxu0 %v758_v0  ;;  %552 = vmatprep.mubr.msk.bf16.mxu0 %vm759_vm0, %v758_v0  ;;  %v623_v4 = vld [vmem:[#allocation4 + $0x20] sm:$0xff]   ;;  %v624_v5 = vld [vmem:[#allocation4 + $0x18] sm:$0xff]   ;;  %vm409_vm1 = vcmask 130048  }
  0x50   : > { %537 = vmatpush3.bf16.msra.mxu0 %v620_v1  ;;  %v625_v6 = vld [vmem:[#allocation4 + $0x10] sm:$0xff]   ;;  %v626_v7 = vld [vmem:[#allocation4 + $0x8] sm:$0xff]   ;;  %v627_v8 = vld [vmem:[#allocation4] sm:$0xff]   ;;  %v239_v11 = vshrl.u32 %v238_v10, 7  ;;  %s948_s16 = smov (!%p213_p7, %s799_s16), 1 }
  0x51   : > { %538 = vmatprep.subr.bf16.mxu0 %v758_v0  ;;  %v628_v9 = vld [vmem:[%s182_s21] sm:$0xff]   ;;  %v219_v13 = vld [vmem:[#allocation6] sm:$0xf]  ;;  %s526_s17 = sshll.u32 %s948_s16, 5 }
  0x52   : > { %v240_v12 = vsub.s32 0, %v239_v11  ;;  %v347_v21 = vsub.s32 3, %v239_v11  ;;  %v367_v39 = vsub.s32 1, %v239_v11  ;;  %v373_v40 = vsub.s32 2, %v239_v11  ;;  %s217_s26 = scalar_lea.vmem %s931_s3, %s526_s17 }
  0x54   : > { %539 = vmatpush3.bf16.msra.mxu0 %v621_v2  ;;  %v241_v14 = vrot.slane %v219_v13, %v240_v12  ;;  %v348_v24 = vrot.slane %v219_v13, %v347_v21  ;;  %v368_v41 = vrot.slane %v219_v13, %v367_v39  ;;  %v374_v44 = vrot.slane %v219_v13, %v373_v40 }
  0x55   : > { %540 = vmatprep.subr.bf16.mxu0 %v758_v0 }
  0x58   : > { %541 = vmatpush3.bf16.msra.mxu0 %v622_v3 }
  0x59   : > { %542 = vmatprep.subr.bf16.mxu0 %v758_v0 }
  0x5c   : > { %543 = vmatpush3.bf16.msra.mxu0 %v623_v4 }
  0x5d   : > { %544 = vmatprep.subr.bf16.mxu0 %v758_v0 }
  0x60   : > { %545 = vmatpush3.bf16.msra.mxu0 %v624_v5 }
  0x61   : > { %546 = vmatprep.subr.bf16.mxu0 %v758_v0 }
  0x64   : > { %547 = vmatpush3.bf16.msra.mxu0 %v625_v6 }
  0x65   : > { %548 = vmatprep.subr.bf16.mxu0 %v758_v0 }
  0x68   : > { %549 = vmatpush3.bf16.msra.mxu0 %v626_v7 }
  0x69   : > { %550 = vmatprep.subr.bf16.mxu0 %v758_v0 }
  0x6c   : > { %551 = vmatpush3.bf16.msra.mxu0 %v627_v8 }
  0x6f   : > { %553 = vmatmul.mubr.bf16.vlgmr.msra.gmra.mxu0 %v628_v9 }
 0x12f   : > { %v330_v15 = vpop.f32.mrf.mxu0 }
 0x130   : > { %v331_v16 = vadd.f32 %v330_v15, %v241_v14 }
 0x131   : > { %v554_v17 = vpop.f32.mrf.mxu0 }
 0x132   : > { %337 = vadd.xlane.f32.xlu0 %v331_v16 }
 0x133   : > { %v333_v18 = vpop.f32.mrf.mxu0 }
 0x134   : > { %v334_v19 = vadd.f32 %v333_v18, %v241_v14 }
 0x135   : > { %v555_v20 = vpop.f32.mrf.mxu0 }
 0x136   : > { %339 = vadd.xlane.f32.xlu0 %v334_v19 }
 0x1bb   : > { %v338_v22 = vpop.xlane.xlu0 %337 }
 0x1bc   : > { %v341_v23 = vmul.f32 0.03125, %v338_v22 }
 0x1be   : > { %v343_v25 = vsub.f32 %v331_v16, %v341_v23 }
 0x1bf   : > { %v340_v26 = vpop.xlane.xlu0 %339 }
 0x1c0   : > { %v342_v27 = vmul.f32 0.03125, %v340_v26  ;;  %v349_v28 = vmul.f32 %v348_v24, %v343_v25 }
 0x1c2   : > { %v344_v29 = vsub.f32 %v334_v19, %v342_v27  ;;  %v351_v30 = vmul.f32 %v349_v28, %v349_v28 }
 0x1c4   : > { %353 = vadd.xlane.f32.xlu1 %v351_v30  ;;  %v350_v31 = vmul.f32 %v348_v24, %v344_v29 }
 0x1c6   : > { %v352_v32 = vmul.f32 %v350_v31, %v350_v31 }
 0x1c8   : > { %355 = vadd.xlane.f32.xlu1 %v352_v32 }
 0x24d   : > { %v354_v33 = vpop.xlane.xlu1 %353 }
 0x24e   : > { %v357_v34 = vmul.f32 0.03125, %v354_v33 }
 0x250   : > { %v359_v35 = vadd.f32 1e-05, %v357_v34 }
 0x251   : > { %v356_v36 = vpop.xlane.xlu1 %355 }
 0x252   : > { %629 = vrsqrt.f32 %v359_v35  ;;  %v358_v37 = vmul.f32 0.03125, %v356_v36 }
 0x254   : > { %v360_v38 = vadd.f32 1e-05, %v358_v37 }
 0x256   : > { %631 = vrsqrt.f32 %v360_v38 }
 0x25f   : > { %v630_v42 = vpop.eup %629 }
 0x260   : > { %v363_v43 = vmul.f32 %v630_v42, %v349_v28 }
 0x262   : > { %v369_v45 = vmul.f32 %v368_v41, %v363_v43 }
 0x263   : > { %v632_v46 = vpop.eup %631 }
 0x264   : > { %v375_v47 = vadd.f32 %v374_v44, %v369_v45  ;;  %v364_v48 = vmul.f32 %v632_v46, %v350_v31 }
 0x266   : > { %377 = vxpose.xlu0.b32.start [1/2] (short) (narrow) %v375_v47, 32  ;;  %v370_v49 = vmul.f32 %v368_v41, %v364_v48 }
 0x268   : > { %v376_v50 = vadd.f32 %v374_v44, %v370_v49 }
 0x26a   : > { %378 = vxpose.xlu0.b32.end [2/2] (short) (narrow) %v376_v50, 32 }
 0x2e2   : > { %v393_v51 = vpop.trf.xlu0 }
 0x2e3   : > { %410 = vst.msk [vmem:[%s217_s26] sm:$0xff] %vm409_vm1, %v393_v51 }
 0x2e6   : > { %v394_v52 = vpop.trf.xlu0 }
 0x2e7   : > { %411 = vst.msk [vmem:[%s217_s26 + $0x8] sm:$0xff] %vm409_vm1, %v394_v52 }
 0x2ea   : > { %v395_v53 = vpop.trf.xlu0 }
 0x2eb   : > { %412 = vst.msk [vmem:[%s217_s26 + $0x10] sm:$0xff] %vm409_vm1, %v395_v53 }
 0x2ee   : > { %v396_v54 = vpop.trf.xlu0 }
 0x2ef   : > { %413 = vst.msk [vmem:[%s217_s26 + $0x18] sm:$0xff] %vm409_vm1, %v396_v54 }
 0x2f0 PF: > { %p14_p12 = scmp.ge.s32.totalorder %s845_s5, 4   ;;  %s943_s12 = smov %s743_s13 }
 0x2f1   : > { %s944_s13 = smov %s747_s14  ;;  %s945_s14 = smov %s856_s9 }
 0x2f2   : > { %s946_s15 = smov %s845_s5  ;;  %16 = sbr.rel (!%p14_p12) target bundleno = 4 (0x4), region = 80 }
 0x2f7   :  { %435 = vsyncpa [#allocation3], 1 }
 0x2f8   :  { %437 = vsyncpa [#allocation3 + $0x1], 1 }
 0x2f9   :  { %438 = vsyncpa [#allocation5], 1 }

</bundles_post_ra>
